<compile_context>
chip_gen: v6e
topology: v6e:2x2x1
jax: 0.10.0
libtpu: 0.0.40
codegen_flags: <defaults>
</compile_context>

<pallas_src>
from collections import namedtuple

import jax
import jax.numpy as jnp
from jax.experimental import pallas as pl
from jax.experimental.pallas import tpu as pltpu


# ----------------------------- VMEM / tile selection ------------------------ #

_FALLBACK_VMEM_CAP = 64 * 1024 * 1024   # v7x per-core VMEM (smallest generation)


def _vmem_params():
    """Generation-aware (hidden-block budget, vmem_limit_bytes)."""
    try:
        cap = int(getattr(pltpu.get_tpu_info(), "vmem_capacity_bytes",
                          _FALLBACK_VMEM_CAP))
    except Exception:  # no TPU info available; stay v7x-safe
        cap = _FALLBACK_VMEM_CAP
    cap = max(cap, 32 * 1024 * 1024)
    block_budget = (3 * cap) // 8     # for the double-buffered input blocks
    vmem_limit = (3 * cap) // 4       # headroom for upcast temporaries / output
    return block_budget, vmem_limit


def _sublane(itemsize):
    return {4: 8, 2: 16, 1: 32}.get(int(itemsize), 8)


def _choose_tb(B, out_itemsize):
    """Batch tile: largest sublane-aligned divisor of B that still leaves >= 2
    blocks on the parallel axis (both v7x TensorCores get work).  Falls back to
    the whole batch (block dim == full array dim is always layout-legal)."""
    sub = _sublane(out_itemsize)
    cap = 64
    best = None
    t = sub
    while t <= min(B // 2, cap):
        if B % t == 0:
            best = t
        t += sub
    return best if best is not None else B


def _choose_ts(S, TB, H, n_hidden, h_itemsize, budget, max_ts_cap=None):
    """Sequence tile: largest divisor of S keeping the double-buffered hidden
    (+mask) blocks inside the VMEM budget, preferring sublane alignment."""
    sub = _sublane(h_itemsize)
    per_pos = 2 * (n_hidden * TB * H * h_itemsize + TB * 4)  # 2x double-buffer
    max_ts = max(1, budget // max(1, per_pos))
    if max_ts_cap is not None:
        max_ts = min(max_ts, max_ts_cap)
    if S <= max_ts:
        return S
    for cand in range(min(S - 1, max_ts), 0, -1):
        if S % cand == 0 and cand % sub == 0:
            return cand
    # No sublane-aligned divisor fits the budget: take the largest divisor that
    # fits rather than falling back to TS = S (which could blow vmem_limit).
    for cand in range(min(S - 1, max_ts), 0, -1):
        if S % cand == 0:
            return cand
    return 1


def _needed_sblocks(mask_f32, TB, TS):
    """Per-B-tile count of S blocks containing any non-padding token (exact:
    every skipped block has an all-zero mask inside its B tile)."""
    B, S = mask_f32.shape
    nz = mask_f32 != 0
    last = (S - 1) - jnp.argmax(jnp.flip(nz, axis=-1), axis=-1)
    lengths = jnp.where(nz.any(axis=-1), last + 1, 0)
    per_tile = lengths.reshape(B // TB, TB).max(axis=-1)
    return ((per_tile + TS - 1) // TS).astype(jnp.int32)


# ----------------------------- kernel -------------------------------------- #

def _make_masked_avg_kernel(n_hidden, scale):
    """Masked average over S of (sum of n_hidden hidden tensors) * scale."""

    def kernel(count_ref, mask_ref, *args):
        h_refs = args[:n_hidden]
        out_ref = args[n_hidden]
        num_acc = args[n_hidden + 1]
        den_acc = args[n_hidden + 2]

        b = pl.program_id(0)
        s = pl.program_id(1)

        @pl.when(s == 0)
        def _init():
            num_acc[...] = jnp.zeros_like(num_acc)
            den_acc[...] = jnp.zeros_like(den_acc)

        # Skip fully-padded S blocks entirely (their mask is all zero, so the
        # skipped contribution is exactly zero).
        @pl.when(s < count_ref[b])
        def _accumulate():
            m = mask_ref[...].astype(jnp.float32)          # (TB, TS, 1)
            h = h_refs[0][...].astype(jnp.float32)         # (TB, TS, H)
            if n_hidden == 2:
                h = h + h_refs[1][...].astype(jnp.float32)
            num_acc[...] += jnp.sum(h * m, axis=1)         # (TB, H)
            den_acc[...] += jnp.sum(m, axis=1)             # (TB, 1)

        @pl.when(s == pl.num_programs(1) - 1)
        def _finalize():
            num = num_acc[...]
            if scale != 1.0:
                num = num * scale                          # folded /2 for avg2
            # den == 0 (all-padding row) -> inf/nan, matching the reference.
            out_ref[...] = (num / den_acc[...]).astype(out_ref.dtype)

    return kernel


# --------------------------- pallas wrapper --------------------------------- #

def _masked_avg_pool(attention_mask, hiddens, scale, max_ts_cap=None):
    n_hidden = len(hiddens)
    B, S, H = hiddens[0].shape
    h_dtype = hiddens[0].dtype
    itemsize = jnp.dtype(h_dtype).itemsize

    # Cast to f32 in the wrapper (avoids bool/int8 min-tile issues); the
    # (B, S, 1) view lets the mask tile exactly like the hidden blocks.
    mask_f32 = attention_mask.astype(jnp.float32)
    mask3 = mask_f32[:, :, None]

    TB = _choose_tb(B, itemsize)
    budget, vmem_limit = _vmem_params()
    TS = _choose_ts(S, TB, H, n_hidden, itemsize, budget, max_ts_cap)
    nb, ns = B // TB, S // TS

    counts = _needed_sblocks(mask_f32, TB, TS)     # (nb,) int32, scalar-prefetch

    def block_map(b, s, counts_ref):
        # Clamp the S block index to the last needed block so fully-padded
        # blocks re-use the resident block (no new DMA is issued).
        c = counts_ref[b]
        s_eff = jnp.maximum(0, jnp.minimum(s, c - 1))
        return (b, s_eff, 0)

    in_specs = [pl.BlockSpec((TB, TS, 1), block_map)]            # mask view
    in_specs += [pl.BlockSpec((TB, TS, H), block_map)] * n_hidden

    bytes_accessed = (n_hidden * B * S * H * itemsize + B * S * 4
                      + B * H * itemsize)

    return pl.pallas_call(
        _make_masked_avg_kernel(n_hidden, scale),
        out_shape=jax.ShapeDtypeStruct((B, H), h_dtype),
        grid_spec=pltpu.PrefetchScalarGridSpec(
            num_scalar_prefetch=1,
            grid=(nb, ns),
            in_specs=in_specs,
            out_specs=pl.BlockSpec((TB, H), lambda b, s, counts_ref: (b, 0)),
            scratch_shapes=[
                pltpu.VMEM((TB, H), jnp.float32),   # numerator accumulator
                pltpu.VMEM((TB, 1), jnp.float32),   # denominator accumulator
            ],
        ),
        compiler_params=pltpu.CompilerParams(
            dimension_semantics=("parallel", "arbitrary"),
            vmem_limit_bytes=vmem_limit,
        ),
        cost_estimate=pl.CostEstimate(
            flops=(2 * n_hidden + 1) * B * S * H,
            transcendentals=0,
            bytes_accessed=bytes_accessed,
        ),
    )(counts, mask3, *hiddens)


# ------------------------------ module -------------------------------------- #

# Mimics the HuggingFace model outputs the PyTorch module consumes.
Outputs = namedtuple("Outputs", ["last_hidden_state", "pooler_output", "hidden_states"])


class Pooler:
    """Pallas-backed equivalent of simcse.models.Pooler (parameter-free)."""

    def __init__(self, pooler_type):
        assert pooler_type in [
            "cls", "cls_before_pooler", "avg", "avg_top2", "avg_first_last"
        ], "unrecognized pooling type %s" % pooler_type
        self.pooler_type = pooler_type

    def __call__(self, attention_mask, outputs, max_ts_cap=None):
        last_hidden = outputs.last_hidden_state
        hidden_states = outputs.hidden_states
        if self.pooler_type in ["cls_before_pooler", "cls"]:
            # Pure [CLS] slice: one strided read + one write; doing this in XLA
            # avoids an extra dispatch and 2x the HBM traffic (per perf review).
            return last_hidden[:, 0]
        elif self.pooler_type == "avg":
            return _masked_avg_pool(attention_mask, (last_hidden,), 1.0, max_ts_cap)
        elif self.pooler_type == "avg_first_last":
            return _masked_avg_pool(
                attention_mask, (hidden_states[0], hidden_states[-1]), 0.5, max_ts_cap)
        elif self.pooler_type == "avg_top2":
            return _masked_avg_pool(
                attention_mask, (hidden_states[-2], hidden_states[-1]), 0.5, max_ts_cap)
        else:
            raise NotImplementedError


# ------------------------------ reference ----------------------------------- #

def _reference(pooler_type, attention_mask, outputs):
    last_hidden = outputs.last_hidden_state
    hidden_states = outputs.hidden_states
    if pooler_type in ["cls_before_pooler", "cls"]:
        return last_hidden[:, 0]
    if pooler_type == "avg":
        return (last_hidden * attention_mask[:, :, None]).sum(1) / \
            attention_mask.sum(-1)[:, None]
    if pooler_type == "avg_first_last":
        h = (hidden_states[0] + hidden_states[-1]) / 2.0
    else:  # avg_top2
        h = (hidden_states[-2] + hidden_states[-1]) / 2.0
    return (h * attention_mask[:, :, None]).sum(1) / attention_mask.sum(-1)[:, None]


# -------------------------------- main --------------------------------------- #

if __name__ == "__main__":
    ok = True

    # --- small config (B=2, S=8, H=32): all pooler types ---------------------
    B, S, H = 2, 8, 32
    n_layers = 4
    key = jax.random.PRNGKey(0)
    keys = jax.random.split(key, n_layers + 1)
    hidden_states = tuple(
        jax.random.normal(keys[i], (B, S, H), dtype=jnp.float32)
        for i in range(n_layers)
    )
    last_hidden = hidden_states[-1]
    pooler_output = jax.random.normal(keys[n_layers], (B, H), dtype=jnp.float32)
    lengths = jnp.array([8, 5], dtype=jnp.int32)          # one padded row
    attention_mask = (jnp.arange(S)[None, :] < lengths[:, None]).astype(jnp.float32)
    outputs = Outputs(last_hidden, pooler_output, hidden_states)

    for pooler_type in ["cls", "cls_before_pooler", "avg", "avg_first_last", "avg_top2"]:
        out = jax.block_until_ready(Pooler(pooler_type)(attention_mask, outputs))
        ref = _reference(pooler_type, attention_mask, outputs)
        if out.shape != (B, H) or not jnp.allclose(out, ref, atol=1e-5, rtol=1e-5):
            ok = False
            print("MISMATCH small/%s" % pooler_type)

    # --- moderate config: exercises 2 B-blocks, 4 S-blocks and padded-block
    # skipping (max_ts_cap=64 forces TS=64 so some tiles skip 3 of 4 blocks) ---
    B2, S2, H2 = 16, 256, 128
    k0, k1, k2 = jax.random.split(jax.random.PRNGKey(0), 3)
    hs2 = (jax.random.normal(k0, (B2, S2, H2), dtype=jnp.float32),
           jax.random.normal(k1, (B2, S2, H2), dtype=jnp.float32))
    pooled2 = jax.random.normal(k2, (B2, H2), dtype=jnp.float32)
    lengths2 = jnp.array([256, 64, 32, 100, 5, 200, 17, 250,
                          64, 64, 33, 20, 8, 1, 60, 64], dtype=jnp.int32)
    mask2 = (jnp.arange(S2)[None, :] < lengths2[:, None]).astype(jnp.float32)
    outputs2 = Outputs(hs2[-1], pooled2, hs2)

    for pooler_type in ["avg", "avg_first_last"]:
        out = jax.block_until_ready(
            Pooler(pooler_type)(mask2, outputs2, max_ts_cap=64))
        ref = _reference(pooler_type, mask2, outputs2)
        if out.shape != (B2, H2) or not jnp.allclose(out, ref, atol=1e-4, rtol=1e-4):
            ok = False
            print("MISMATCH moderate/%s" % pooler_type)

    if ok:
        print("KERNEL_OK")
</pallas_src>

<mosaic_0001>
module attributes {stable_mosaic.version = 11 : i64} {
  func.func @kernel(%arg0: i32, %arg1: i32, %arg2: memref<1xi32, #tpu.memory_space<smem>>, %arg3: memref<2x8x1xf32, #tpu.memory_space<vmem>>, %arg4: memref<2x8x32xf32, #tpu.memory_space<vmem>>, %arg5: memref<2x32xf32, #tpu.memory_space<vmem>>, %arg6: memref<2x32xf32, #tpu.memory_space<vmem>>, %arg7: memref<2x1xf32, #tpu.memory_space<vmem>>) attributes {dimension_semantics = [#tpu.dimension_semantics<parallel>, #tpu.dimension_semantics<arbitrary>], iteration_bounds = array<i64: 1, 1>, scalar_prefetch = 1 : i64, scratch_operands = 2 : i64, tpu.core_type = #tpu.core_type<tc>, window_params = [{transform_indices = @transform_0, window_bounds = array<i64: 2, 8, 1>}, {transform_indices = @transform_1, window_bounds = array<i64: 2, 8, 32>}, {transform_indices = @transform_2, window_bounds = array<i64: 2, 32>}]} {
    %c0_i32 = arith.constant 0 : i32
    %0 = arith.cmpi eq, %arg1, %c0_i32 : i32
    %1 = arith.extui %0 : i1 to i32
    %c0_i32_0 = arith.constant 0 : i32
    %2 = arith.cmpi ne, %1, %c0_i32_0 : i32
    scf.if %2 {
      %cst = arith.constant 0.000000e+00 : f32
      %11 = vector.broadcast %cst : f32 to vector<2x32xf32>
      %c0 = arith.constant 0 : index
      %c0_4 = arith.constant 0 : index
      %12 = vector.load %arg6[%c0, %c0_4] : memref<2x32xf32, #tpu.memory_space<vmem>>, vector<2x32xf32>
      tpu.vector_store %arg6[%c0, %c0_4], %11 {strides = array<i32>} : memref<2x32xf32, #tpu.memory_space<vmem>>, vector<2x32xf32>,
      %cst_5 = arith.constant 0.000000e+00 : f32
      %13 = vector.broadcast %cst_5 : f32 to vector<2x1xf32>
      %c0_6 = arith.constant 0 : index
      %c0_7 = arith.constant 0 : index
      %14 = vector.load %arg7[%c0_6, %c0_7] : memref<2x1xf32, #tpu.memory_space<vmem>>, vector<2x1xf32>
      tpu.vector_store %arg7[%c0_6, %c0_7], %13 {strides = array<i32>} : memref<2x1xf32, #tpu.memory_space<vmem>>, vector<2x1xf32>,
    } else {
    }
    %3 = arith.index_cast %arg0 : i32 to index
    %4 = memref.load %arg2[%3] : memref<1xi32, #tpu.memory_space<smem>>
    %5 = arith.cmpi slt, %arg1, %4 : i32
    %6 = arith.extui %5 : i1 to i32
    %c0_i32_1 = arith.constant 0 : i32
    %7 = arith.cmpi ne, %6, %c0_i32_1 : i32
    scf.if %7 {
      %c0 = arith.constant 0 : index
      %c0_4 = arith.constant 0 : index
      %c0_5 = arith.constant 0 : index
      %11 = vector.load %arg3[%c0, %c0_4, %c0_5] : memref<2x8x1xf32, #tpu.memory_space<vmem>>, vector<2x8x1xf32>
      %c0_6 = arith.constant 0 : index
      %c0_7 = arith.constant 0 : index
      %c0_8 = arith.constant 0 : index
      %12 = vector.load %arg4[%c0_6, %c0_7, %c0_8] : memref<2x8x32xf32, #tpu.memory_space<vmem>>, vector<2x8x32xf32>
      %c0_9 = arith.constant 0 : index
      %c0_10 = arith.constant 0 : index
      %13 = vector.load %arg6[%c0_9, %c0_10] : memref<2x32xf32, #tpu.memory_space<vmem>>, vector<2x32xf32>
      %14 = vector.broadcast %11 : vector<2x8x1xf32> to vector<2x8x32xf32>
      %15 = arith.mulf %12, %14 : vector<2x8x32xf32>
      %cst = arith.constant dense<0.000000e+00> : vector<2x32xf32>
      %16 = vector.multi_reduction <add>, %15, %cst [1] : vector<2x8x32xf32> to vector<2x32xf32>
      %17 = arith.addf %13, %16 : vector<2x32xf32>
      %c0_11 = arith.constant 0 : index
      %c0_12 = arith.constant 0 : index
      %18 = vector.load %arg6[%c0_11, %c0_12] : memref<2x32xf32, #tpu.memory_space<vmem>>, vector<2x32xf32>
      tpu.vector_store %arg6[%c0_11, %c0_12], %17 {strides = array<i32>} : memref<2x32xf32, #tpu.memory_space<vmem>>, vector<2x32xf32>,
      %c0_13 = arith.constant 0 : index
      %c0_14 = arith.constant 0 : index
      %19 = vector.load %arg7[%c0_13, %c0_14] : memref<2x1xf32, #tpu.memory_space<vmem>>, vector<2x1xf32>
      %cst_15 = arith.constant dense<0.000000e+00> : vector<2x1xf32>
      %20 = vector.multi_reduction <add>, %11, %cst_15 [1] : vector<2x8x1xf32> to vector<2x1xf32>
      %21 = arith.addf %19, %20 : vector<2x1xf32>
      %c0_16 = arith.constant 0 : index
      %c0_17 = arith.constant 0 : index
      %22 = vector.load %arg7[%c0_16, %c0_17] : memref<2x1xf32, #tpu.memory_space<vmem>>, vector<2x1xf32>
      tpu.vector_store %arg7[%c0_16, %c0_17], %21 {strides = array<i32>} : memref<2x1xf32, #tpu.memory_space<vmem>>, vector<2x1xf32>,
    } else {
    }
    %c0_i32_2 = arith.constant 0 : i32
    %8 = arith.cmpi eq, %arg1, %c0_i32_2 : i32
    %9 = arith.extui %8 : i1 to i32
    %c0_i32_3 = arith.constant 0 : i32
    %10 = arith.cmpi ne, %9, %c0_i32_3 : i32
    scf.if %10 {
      %c0 = arith.constant 0 : index
      %c0_4 = arith.constant 0 : index
      %11 = vector.load %arg6[%c0, %c0_4] : memref<2x32xf32, #tpu.memory_space<vmem>>, vector<2x32xf32>
      %c0_5 = arith.constant 0 : index
      %c0_6 = arith.constant 0 : index
      %12 = vector.load %arg7[%c0_5, %c0_6] : memref<2x1xf32, #tpu.memory_space<vmem>>, vector<2x1xf32>
      %13 = vector.broadcast %12 : vector<2x1xf32> to vector<2x32xf32>
      %14 = arith.divf %11, %13 : vector<2x32xf32>
      %c0_7 = arith.constant 0 : index
      %c0_8 = arith.constant 0 : index
      %15 = vector.load %arg5[%c0_7, %c0_8] : memref<2x32xf32, #tpu.memory_space<vmem>>, vector<2x32xf32>
      tpu.vector_store %arg5[%c0_7, %c0_8], %14 {strides = array<i32>} : memref<2x32xf32, #tpu.memory_space<vmem>>, vector<2x32xf32>,
    } else {
    }
    return
  }
  func.func @transform_0(%arg0: i32, %arg1: i32, %arg2: memref<1xi32, #tpu.memory_space<smem>>) -> (i32, i32, i32) {
    %0 = arith.index_cast %arg0 : i32 to index
    %1 = memref.load %arg2[%0] : memref<1xi32, #tpu.memory_space<smem>>
    %c1_i32 = arith.constant 1 : i32
    %2 = arith.subi %1, %c1_i32 : i32
    %3 = arith.minsi %arg1, %2 : i32
    %c0_i32 = arith.constant 0 : i32
    %4 = arith.maxsi %c0_i32, %3 : i32
    %c0_i32_0 = arith.constant 0 : i32
    %c0_i32_1 = arith.constant 0 : i32
    return %arg0, %4, %c0_i32_0 : i32, i32, i32
  }
  func.func @transform_1(%arg0: i32, %arg1: i32, %arg2: memref<1xi32, #tpu.memory_space<smem>>) -> (i32, i32, i32) {
    %0 = arith.index_cast %arg0 : i32 to index
    %1 = memref.load %arg2[%0] : memref<1xi32, #tpu.memory_space<smem>>
    %c1_i32 = arith.constant 1 : i32
    %2 = arith.subi %1, %c1_i32 : i32
    %3 = arith.minsi %arg1, %2 : i32
    %c0_i32 = arith.constant 0 : i32
    %4 = arith.maxsi %c0_i32, %3 : i32
    %c0_i32_0 = arith.constant 0 : i32
    %c0_i32_1 = arith.constant 0 : i32
    return %arg0, %4, %c0_i32_0 : i32, i32, i32
  }
  func.func @transform_2(%arg0: i32, %arg1: i32, %arg2: memref<1xi32, #tpu.memory_space<smem>>) -> (i32, i32) {
    %c0_i32 = arith.constant 0 : i32
    %c0_i32_0 = arith.constant 0 : i32
    return %arg0, %c0_i32 : i32, i32
  }
}

</mosaic_0001>

<bundles_post_ra>
// kernel: tpu_custom_call.1
= control target key start
LH: loop header
LB: loop body
LE: loop exit
PB: predicated region body
PF: predicated region fallthrough
CT: control target
= control target key end

     0   :  { %9 = vsyncpa [#allocation7], 0  ;;  %vm102_vm0 = vcmask 254976   ;;  %vm104_vm1 = vcmask 1024   ;;  %v262_v0 = vmov 0.0   ;;  %s311_s0 = inlined_call_operand.<no memory space> [shape: s32[1], index: 0, kind: input, shape index: {}]   ;;  %s312_s1 = inlined_call_operand.vmem [shape: f32[2,8,1], index: 1, kind: input, shape index: {}]   ;;  %s313_s2 = inlined_call_operand.vmem [shape: f32[2,8,32], index: 2, kind: input, shape index: {}]   ;;  %s314_s3 = inlined_call_operand.hbm [shape: f32[2,32], index: 3, kind: output, shape index: {}]  }
   0x1   :  { %103 = vst.msk [vmem:[#allocation2] sm:$0x3] %vm102_vm0, %v262_v0  ;;  %p231_p0 = scmp.le.s32.totalorder %s311_s0, 0 }
   0x2   :  { %105 = vst.msk [vmem:[#allocation3] sm:$0x3] %vm104_vm1, %v262_v0 }
   0x3   :  { %110 = sbr.rel (%p231_p0) target bundleno = 157 (0x9d), region = 17 }
   0x8   :  { %v111_v1 = vld [vmem:[%s312_s1] sm:$0xff]  ;;  %vm152_vm2 = vcmask 7168   ;;  %v112_v2 = vld [vmem:[%s312_s1 + $0x8] sm:$0xff]  ;;  %v263_v3 = vmov 0   ;;  %vm145_vm3 = vcmask 1041409   ;;  %vm128_vm4 = vcmask 261120  }
   0x9   :  { %236 = vset.pattern.permute.xlu0 %v263_v3  ;;  %v153_v4 = vsel %vm152_vm2, %v111_v1, 0.0  ;;  %v160_v5 = vsel %vm152_vm2, %v112_v2, 0.0  ;;  %v151_v17 = vld [vmem:[#allocation3] sm:$0x3]  ;;  %v114_v24 = vld [vmem:[%s313_s2 + $0x8] sm:$0xff] }
   0xa   :  { %118 = vperm.xlu0 %236, %v111_v1   ;;  %v154_v6 = vrot.slane %v153_v4, 4  ;;  %v161_v7 = vrot.slane %v160_v5, 4  ;;  %v113_v21 = vld [vmem:[%s313_s2] sm:$0xff] }
   0xb   :  { %v115_v40 = vld [vmem:[#allocation2] sm:$0x3] }
   0xc   :  { %v155_v8 = vadd.f32 %v154_v6, %v153_v4  ;;  %v162_v9 = vadd.f32 %v161_v7, %v160_v5 }
   0xe   :  { %v156_v10 = vrot.slane %v155_v8, 2  ;;  %v163_v11 = vrot.slane %v162_v9, 2  ;;  %123 = vperm.xlu0 %236, %v112_v2  }
  0x10   :  { %v157_v12 = vadd.f32 %v156_v10, %v155_v8  ;;  %v164_v13 = vadd.f32 %v163_v11, %v162_v9 }
  0x12   :  { %v158_v14 = vrot.slane %v157_v12, 1  ;;  %v165_v15 = vrot.slane %v164_v13, 1 }
  0x14   :  { %v159_v16 = vadd.f32 %v158_v14, %v157_v12  ;;  %v166_v18 = vadd.f32 %v165_v15, %v164_v13 }
  0x16   :  { %v169_v19 = vsel %vm145_vm3, %v166_v18, %v159_v16 }
  0x17   :  { %v171_v20 = vadd.f32 %v169_v19, %v151_v17 }
  0x19   :  { %173 = vst.msk [vmem:[#allocation3] sm:$0x3] %vm104_vm1, %v171_v20 }
  0x85   :  { %v119_v22 = vpop.permute.xlu0 %118 }
  0x86   :  { %v126_v23 = vmul.f32 %v119_v22, %v113_v21 }
  0x88   :  { %v129_v25 = vsel %vm128_vm4, %v126_v23, 0.0 }
  0x89   :  { %v130_v26 = vrot.slane %v129_v25, 4  ;;  %v124_v27 = vpop.permute.xlu0 %123 }
  0x8a   :  { %v127_v28 = vmul.f32 %v124_v27, %v114_v24 }
  0x8b   :  { %v131_v29 = vadd.f32 %v130_v26, %v129_v25 }
  0x8c   :  { %v136_v30 = vsel %vm128_vm4, %v127_v28, 0.0 }
  0x8d   :  { %v132_v31 = vrot.slane %v131_v29, 2  ;;  %v137_v32 = vrot.slane %v136_v30, 4 }
  0x8f   :  { %v133_v33 = vadd.f32 %v132_v31, %v131_v29  ;;  %v138_v34 = vadd.f32 %v137_v32, %v136_v30 }
  0x91   :  { %v139_v35 = vrot.slane %v138_v34, 2  ;;  %v134_v36 = vrot.slane %v133_v33, 1 }
  0x93   :  { %v140_v37 = vadd.f32 %v139_v35, %v138_v34  ;;  %v135_v39 = vadd.f32 %v134_v36, %v133_v33 }
  0x95   :  { %v141_v38 = vrot.slane %v140_v37, 1 }
  0x97   :  { %v142_v41 = vadd.f32 %v141_v38, %v140_v37 }
  0x99   :  { %v146_v42 = vsel %vm145_vm3, %v142_v41, %v135_v39 }
  0x9a   :  { %v148_v43 = vadd.f32 %v146_v42, %v115_v40 }
  0x9c   :  { %150 = vst.msk [vmem:[#allocation2] sm:$0x3] %vm102_vm0, %v148_v43 }
  0x9d PF:  { %v264_v45 = vmov 0   ;;  %s265_s2 = smov [#allocation6]  }
  0x9e   :  { %v178_v44 = vld [vmem:[#allocation3] sm:$0x3]  ;;  %237 = vset.pattern.permute.xlu0 %v264_v45  ;;  %s194_s20 = sshll.u32 %s265_s2, 4  ;;  %s195_s20 = int_to_ptr.vmem [resolvable:$true] %s194_s20 }
  0x9f   :  { %181 = vperm.xlu0 %237, %v178_v44   ;;  %s240_s21 = scalar_lea.vmem %s195_s20, 32  ;;  %p245_p2 = scmp.lt.s32.totalorder %s195_s20, %s195_s20 }
  0xa0   :  { %p241_p1 = scmp.ne.s32.totalorder %s195_s20, %s240_s21  ;;  %p246_p3 = scmp.lt.s32.totalorder %s240_s21, %s240_s21 }
  0xa2   :  { %p247_p4 = por %p246_p3, %p245_p2 }
  0xa3   :  { %v177_v47 = vld [vmem:[#allocation2] sm:$0x3] }
  0xa4   :  { %p248_p5 = pnand %p247_p4, %p241_p1 }
 0x11a   :  { %v182_v46 = vpop.permute.xlu0 %181 }
 0x11b   :  { %238 = vrcp.f32 %v182_v46 }
 0x128   :  { %v239_v48 = vpop.eup %238 }
 0x129   :  { %v185_v49 = vmul.f32 %v239_v48, %v177_v47 }
 0x12b   :  { %187 = vst.msk [vmem:[#allocation6] sm:$0x3] %vm102_vm0, %v185_v49 }
 0x12c   :  { %251 = shalt.err (!%p248_p5)
}
 0x12d   :  { %197 = dma.vmem_to_hbm [thread:$0]  %s195_s20, 32, %s314_s3, [#allocation7]  }
 0x12e   :  { %260 = dma.done.wait [#allocation7], 32  }
 0x12f   :  { %261 = vsyncadd [#allocation7], 4294967264 }
 0x130   :  { %201 = vsyncpa [#allocation7], 1 }

</bundles_post_ra>
